<compile_context>
chip_gen: v5e
topology: v5e:2x2
jax: 0.10.0
libtpu: 0.0.40
codegen_flags: <defaults>
</compile_context>

<pallas_src>
import functools

import jax
import jax.numpy as jnp
from jax.experimental import pallas as pl
from jax.experimental.pallas import tpu as pltpu

IN_F, H1, H2, OUT_F = 8, 6, 4, 1

# Default batch tile (columns per grid step).  Per-step footprint:
#   pipeline buffers: 2*(8+1)*4 B/col = 72 B/col
#   in-kernel intermediates (acc/broadcast/product, bounded by liveness): ~100 B/col
# -> ~22-25 MiB at 128K columns, comfortably under the 48 MiB v7x-safe limit.
_DEFAULT_TILE_N = 128 * 1024
_VMEM_LIMIT_BYTES = 48 * 1024 * 1024  # safe on v7x (64 MiB VMEM); raise on v5e/v6e.


def _round_up(n, m):
    return ((n + m - 1) // m) * m


def _sigmoid(z, approx):
    # exp and reciprocal both run on the EUP slot (free next to the VPU MACs).
    # approx=True -> HW reciprocal (~1e-4 accuracy); approx=False -> exact.
    return pl.reciprocal(1.0 + jnp.exp(-z), approx=approx)


def _dense_sigmoid(h, w, b, approx):
    # h: (K, T) activations, w: (M, K), b: (M, 1)  ->  sigmoid(w @ h + b): (M, T)
    # Unrolled VPU broadcast-MACs instead of an MXU dot: with K <= 8, M <= 6 the
    # MXU's fixed column-streaming cadence would cap throughput far below the
    # HBM roofline, while ~2 VPU ops per input feature per vreg-chunk do not.
    m, k = w.shape
    t = h.shape[-1]
    acc = jnp.broadcast_to(b, (m, t))                 # bias-initialised accumulator
    for j in range(k):                                # static unroll, K <= 8
        # (M,1) lane-broadcast weight column  *  (1,T) sublane-broadcast activation row
        acc = acc + w[:, j:j + 1] * h[j:j + 1, :]
    return _sigmoid(acc, approx)


def _mlp_kernel(x_ref, w1_ref, b1_ref, w2_ref, b2_ref, w3_ref, b3_ref, o_ref,
                *, approx):
    # One batch tile, feature-major layout: batch sits on the 128-lane axis so
    # every intermediate (6,T), (4,T), (1,T) and the output store are lane-dense.
    #   x_ref: (8, T)   w_k: (out_k, in_k)   b_k: (out_k, 1)   o_ref: (1, T)
    h1 = _dense_sigmoid(x_ref[...], w1_ref[...], b1_ref[...], approx)  # (6, T)
    h2 = _dense_sigmoid(h1, w2_ref[...], b2_ref[...], approx)         # (4, T)
    y = _dense_sigmoid(h2, w3_ref[...], b3_ref[...], approx)          # (1, T)
    o_ref[...] = y.astype(o_ref.dtype)


def nn_forward_feature_major(xt, params, *, tile_n=_DEFAULT_TILE_N,
                             approx_sigmoid=True):
    """Native (preferred) contract: xt is feature-major (8, N) float32.

    Returns the prediction feature-major as (1, N).  No wrapper-side transpose;
    if N is already a multiple of 128 there is no wrapper copy at all.
    """
    w1, b1, w2, b2, w3, b3 = params
    n = xt.shape[1]

    # Pad only to the lane width (128), never to a multiple of the (large) tile.
    n_pad = _round_up(n, 128)
    if n_pad != n:
        xt = jnp.pad(xt, ((0, 0), (0, n_pad - n)))

    tile = min(tile_n, n_pad)
    if n_pad >= 4 * 128:
        # Keep >= 2 grid steps so ("parallel",) can shard batch tiles across
        # both TensorCores on v7x (single-step grids leave one TC idle).
        tile = min(tile, _round_up((n_pad + 1) // 2, 128))
    num_tiles = pl.cdiv(n_pad, tile)  # ragged last block: OOB reads garbage
    #                                   (independent columns), OOB writes dropped.

    def const_spec(shape):
        # Full-array block with a constant index_map -> VMEM-resident across grid.
        return pl.BlockSpec(shape, lambda i: (0, 0))

    cost = pl.CostEstimate(
        flops=2 * (IN_F * H1 + H1 * H2 + H2 * OUT_F) * n_pad,      # ~152 * N MAC flops
        transcendentals=2 * (H1 + H2 + OUT_F) * n_pad,             # sigmoid = exp + recip
        bytes_accessed=4 * (IN_F + OUT_F) * n_pad,                 # ~36 B / sample
    )

    out = pl.pallas_call(
        functools.partial(_mlp_kernel, approx=approx_sigmoid),
        out_shape=jax.ShapeDtypeStruct((OUT_F, n_pad), jnp.float32),
        grid=(num_tiles,),
        in_specs=[
            pl.BlockSpec((IN_F, tile), lambda i: (0, i)),
            const_spec(w1.shape),
            const_spec(b1.shape),
            const_spec(w2.shape),
            const_spec(b2.shape),
            const_spec(w3.shape),
            const_spec(b3.shape),
        ],
        out_specs=pl.BlockSpec((OUT_F, tile), lambda i: (0, i)),
        compiler_params=pltpu.CompilerParams(
            dimension_semantics=("parallel",),
            vmem_limit_bytes=_VMEM_LIMIT_BYTES,
        ),
        cost_estimate=cost,
    )(xt, w1, b1, w2, b2, w3, b3)

    return out[:, :n]


def nn_forward(x, params, *, tile_n=_DEFAULT_TILE_N, approx_sigmoid=True):
    """PyTorch-style contract: x is (N, 8); returns (N, 1).

    Note: the transpose to the kernel's feature-major layout costs one extra
    HBM pass; latency-sensitive callers should hold x as (8, N) and use
    nn_forward_feature_major directly.
    """
    yt = nn_forward_feature_major(x.T, params, tile_n=tile_n,
                                  approx_sigmoid=approx_sigmoid)
    return yt.T


def init_params(key):
    # torch.nn.Linear default init: U(-1/sqrt(fan_in), +1/sqrt(fan_in)).
    # Weights stored PyTorch-style (out_features, in_features); biases (out, 1).
    def linear(key, fan_in, fan_out):
        kw, kb = jax.random.split(key)
        bound = 1.0 / jnp.sqrt(jnp.float32(fan_in))
        w = jax.random.uniform(kw, (fan_out, fan_in), jnp.float32, -bound, bound)
        b = jax.random.uniform(kb, (fan_out, 1), jnp.float32, -bound, bound)
        return w, b

    k1, k2, k3 = jax.random.split(key, 3)
    w1, b1 = linear(k1, IN_F, H1)
    w2, b2 = linear(k2, H1, H2)
    w3, b3 = linear(k3, H2, OUT_F)
    return (w1, b1, w2, b2, w3, b3)


def reference_forward(x, params):
    w1, b1, w2, b2, w3, b3 = params
    h1 = jax.nn.sigmoid(x @ w1.T + b1.T)
    h2 = jax.nn.sigmoid(h1 @ w2.T + b2.T)
    return jax.nn.sigmoid(h2 @ w3.T + b3.T)


if __name__ == "__main__":
    key = jax.random.PRNGKey(0)
    kx, kp = jax.random.split(key)
    params = init_params(kp)

    # 1) Small test consistent with the module: x of shape (batch, 8).
    #    Exact sigmoid path -> tight tolerance.
    batch = 8
    x = jax.random.normal(kx, (batch, IN_F), dtype=jnp.float32)
    y = jax.block_until_ready(nn_forward(x, params, approx_sigmoid=False))
    y_ref = reference_forward(x, params)
    assert y.shape == (batch, 1)
    assert jnp.allclose(y, y_ref, atol=1e-5, rtol=1e-5)

    # 2) Default fast path (approx EUP reciprocal in the sigmoid) -> looser tol.
    y_fast = jax.block_until_ready(nn_forward(x, params))
    assert jnp.allclose(y_fast, y_ref, atol=2e-3, rtol=2e-3)

    # 3) Batch not a multiple of 128 + a multi-tile grid (padding + pipelining).
    batch2 = 200
    x2 = jax.random.normal(jax.random.PRNGKey(1), (batch2, IN_F), dtype=jnp.float32)
    y2 = jax.block_until_ready(
        nn_forward(x2, params, tile_n=128, approx_sigmoid=False))
    y2_ref = reference_forward(x2, params)
    assert y2.shape == (batch2, 1)
    assert jnp.allclose(y2, y2_ref, atol=1e-5, rtol=1e-5)

    # 4) Feature-major (native) contract with a ragged last block
    #    (tile does not divide the padded batch).
    batch3 = 384
    x3t = jax.random.normal(jax.random.PRNGKey(2), (IN_F, batch3), dtype=jnp.float32)
    y3t = jax.block_until_ready(
        nn_forward_feature_major(x3t, params, tile_n=256, approx_sigmoid=False))
    y3_ref = reference_forward(x3t.T, params)
    assert y3t.shape == (OUT_F, batch3)
    assert jnp.allclose(y3t.T, y3_ref, atol=1e-5, rtol=1e-5)

    print("KERNEL_OK")
</pallas_src>

<mosaic_0001>
module attributes {stable_mosaic.version = 11 : i64} {
  func.func @_mlp_kernel(%arg0: i32, %arg1: memref<8x128xf32, #tpu.memory_space<vmem>>, %arg2: memref<6x8xf32, #tpu.memory_space<vmem>>, %arg3: memref<6x1xf32, #tpu.memory_space<vmem>>, %arg4: memref<4x6xf32, #tpu.memory_space<vmem>>, %arg5: memref<4x1xf32, #tpu.memory_space<vmem>>, %arg6: memref<1x4xf32, #tpu.memory_space<vmem>>, %arg7: memref<1x1xf32, #tpu.memory_space<vmem>>, %arg8: memref<1x128xf32, #tpu.memory_space<vmem>>) attributes {dimension_semantics = [#tpu.dimension_semantics<parallel>], iteration_bounds = array<i64: 1>, scalar_prefetch = 0 : i64, scratch_operands = 0 : i64, tpu.core_type = #tpu.core_type<tc>, window_params = [{transform_indices = @transform_0, window_bounds = array<i64: 8, 128>}, {pipeline_mode = #tpu.pipeline_mode<synchronous>, transform_indices = @transform_1, window_bounds = array<i64: 6, 8>}, {pipeline_mode = #tpu.pipeline_mode<synchronous>, transform_indices = @transform_2, window_bounds = array<i64: 6, 1>}, {pipeline_mode = #tpu.pipeline_mode<synchronous>, transform_indices = @transform_3, window_bounds = array<i64: 4, 6>}, {pipeline_mode = #tpu.pipeline_mode<synchronous>, transform_indices = @transform_4, window_bounds = array<i64: 4, 1>}, {pipeline_mode = #tpu.pipeline_mode<synchronous>, transform_indices = @transform_5, window_bounds = array<i64: 1, 4>}, {pipeline_mode = #tpu.pipeline_mode<synchronous>, transform_indices = @transform_6, window_bounds = array<i64: 1, 1>}, {transform_indices = @transform_7, window_bounds = array<i64: 1, 128>}]} {
    %c0 = arith.constant 0 : index
    %c0_0 = arith.constant 0 : index
    %0 = vector.load %arg1[%c0, %c0_0] : memref<8x128xf32, #tpu.memory_space<vmem>>, vector<8x128xf32>
    %c0_1 = arith.constant 0 : index
    %c0_2 = arith.constant 0 : index
    %1 = vector.load %arg2[%c0_1, %c0_2] : memref<6x8xf32, #tpu.memory_space<vmem>>, vector<6x8xf32>
    %c0_3 = arith.constant 0 : index
    %c0_4 = arith.constant 0 : index
    %2 = vector.load %arg3[%c0_3, %c0_4] : memref<6x1xf32, #tpu.memory_space<vmem>>, vector<6x1xf32>
    %3 = vector.shape_cast %2 : vector<6x1xf32> to vector<6x1xf32>
    %4 = vector.broadcast %3 : vector<6x1xf32> to vector<6x128xf32>
    %5 = vector.extract_strided_slice %1 {offsets = [0, 0], sizes = [6, 1], strides = [1, 1]} : vector<6x8xf32> to vector<6x1xf32>
    %6 = vector.extract_strided_slice %0 {offsets = [0, 0], sizes = [1, 128], strides = [1, 1]} : vector<8x128xf32> to vector<1x128xf32>
    %7 = vector.broadcast %5 : vector<6x1xf32> to vector<6x128xf32>
    %8 = vector.broadcast %6 : vector<1x128xf32> to vector<6x128xf32>
    %9 = arith.mulf %7, %8 : vector<6x128xf32>
    %10 = arith.addf %4, %9 : vector<6x128xf32>
    %11 = vector.extract_strided_slice %1 {offsets = [0, 1], sizes = [6, 1], strides = [1, 1]} : vector<6x8xf32> to vector<6x1xf32>
    %12 = vector.extract_strided_slice %0 {offsets = [1, 0], sizes = [1, 128], strides = [1, 1]} : vector<8x128xf32> to vector<1x128xf32>
    %13 = vector.broadcast %11 : vector<6x1xf32> to vector<6x128xf32>
    %14 = vector.broadcast %12 : vector<1x128xf32> to vector<6x128xf32>
    %15 = arith.mulf %13, %14 : vector<6x128xf32>
    %16 = arith.addf %10, %15 : vector<6x128xf32>
    %17 = vector.extract_strided_slice %1 {offsets = [0, 2], sizes = [6, 1], strides = [1, 1]} : vector<6x8xf32> to vector<6x1xf32>
    %18 = vector.extract_strided_slice %0 {offsets = [2, 0], sizes = [1, 128], strides = [1, 1]} : vector<8x128xf32> to vector<1x128xf32>
    %19 = vector.broadcast %17 : vector<6x1xf32> to vector<6x128xf32>
    %20 = vector.broadcast %18 : vector<1x128xf32> to vector<6x128xf32>
    %21 = arith.mulf %19, %20 : vector<6x128xf32>
    %22 = arith.addf %16, %21 : vector<6x128xf32>
    %23 = vector.extract_strided_slice %1 {offsets = [0, 3], sizes = [6, 1], strides = [1, 1]} : vector<6x8xf32> to vector<6x1xf32>
    %24 = vector.extract_strided_slice %0 {offsets = [3, 0], sizes = [1, 128], strides = [1, 1]} : vector<8x128xf32> to vector<1x128xf32>
    %25 = vector.broadcast %23 : vector<6x1xf32> to vector<6x128xf32>
    %26 = vector.broadcast %24 : vector<1x128xf32> to vector<6x128xf32>
    %27 = arith.mulf %25, %26 : vector<6x128xf32>
    %28 = arith.addf %22, %27 : vector<6x128xf32>
    %29 = vector.extract_strided_slice %1 {offsets = [0, 4], sizes = [6, 1], strides = [1, 1]} : vector<6x8xf32> to vector<6x1xf32>
    %30 = vector.extract_strided_slice %0 {offsets = [4, 0], sizes = [1, 128], strides = [1, 1]} : vector<8x128xf32> to vector<1x128xf32>
    %31 = vector.broadcast %29 : vector<6x1xf32> to vector<6x128xf32>
    %32 = vector.broadcast %30 : vector<1x128xf32> to vector<6x128xf32>
    %33 = arith.mulf %31, %32 : vector<6x128xf32>
    %34 = arith.addf %28, %33 : vector<6x128xf32>
    %35 = vector.extract_strided_slice %1 {offsets = [0, 5], sizes = [6, 1], strides = [1, 1]} : vector<6x8xf32> to vector<6x1xf32>
    %36 = vector.extract_strided_slice %0 {offsets = [5, 0], sizes = [1, 128], strides = [1, 1]} : vector<8x128xf32> to vector<1x128xf32>
    %37 = vector.broadcast %35 : vector<6x1xf32> to vector<6x128xf32>
    %38 = vector.broadcast %36 : vector<1x128xf32> to vector<6x128xf32>
    %39 = arith.mulf %37, %38 : vector<6x128xf32>
    %40 = arith.addf %34, %39 : vector<6x128xf32>
    %41 = vector.extract_strided_slice %1 {offsets = [0, 6], sizes = [6, 1], strides = [1, 1]} : vector<6x8xf32> to vector<6x1xf32>
    %42 = vector.extract_strided_slice %0 {offsets = [6, 0], sizes = [1, 128], strides = [1, 1]} : vector<8x128xf32> to vector<1x128xf32>
    %43 = vector.broadcast %41 : vector<6x1xf32> to vector<6x128xf32>
    %44 = vector.broadcast %42 : vector<1x128xf32> to vector<6x128xf32>
    %45 = arith.mulf %43, %44 : vector<6x128xf32>
    %46 = arith.addf %40, %45 : vector<6x128xf32>
    %47 = vector.extract_strided_slice %1 {offsets = [0, 7], sizes = [6, 1], strides = [1, 1]} : vector<6x8xf32> to vector<6x1xf32>
    %48 = vector.extract_strided_slice %0 {offsets = [7, 0], sizes = [1, 128], strides = [1, 1]} : vector<8x128xf32> to vector<1x128xf32>
    %49 = vector.broadcast %47 : vector<6x1xf32> to vector<6x128xf32>
    %50 = vector.broadcast %48 : vector<1x128xf32> to vector<6x128xf32>
    %51 = arith.mulf %49, %50 : vector<6x128xf32>
    %52 = arith.addf %46, %51 : vector<6x128xf32>
    %cst = arith.constant 0.000000e+00 : f32
    %53 = vector.broadcast %cst : f32 to vector<6x128xf32>
    %54 = arith.subf %53, %52 : vector<6x128xf32>
    %55 = math.exp %54 : vector<6x128xf32>
    %cst_5 = arith.constant 1.000000e+00 : f32
    %56 = vector.broadcast %cst_5 : f32 to vector<6x128xf32>
    %57 = arith.addf %56, %55 : vector<6x128xf32>
    %58 = tpu.reciprocal %57 : vector<6x128xf32> -> vector<6x128xf32>
    %c0_6 = arith.constant 0 : index
    %c0_7 = arith.constant 0 : index
    %59 = vector.load %arg4[%c0_6, %c0_7] : memref<4x6xf32, #tpu.memory_space<vmem>>, vector<4x6xf32>
    %c0_8 = arith.constant 0 : index
    %c0_9 = arith.constant 0 : index
    %60 = vector.load %arg5[%c0_8, %c0_9] : memref<4x1xf32, #tpu.memory_space<vmem>>, vector<4x1xf32>
    %61 = vector.shape_cast %60 : vector<4x1xf32> to vector<4x1xf32>
    %62 = vector.broadcast %61 : vector<4x1xf32> to vector<4x128xf32>
    %63 = vector.extract_strided_slice %59 {offsets = [0, 0], sizes = [4, 1], strides = [1, 1]} : vector<4x6xf32> to vector<4x1xf32>
    %64 = vector.extract_strided_slice %58 {offsets = [0, 0], sizes = [1, 128], strides = [1, 1]} : vector<6x128xf32> to vector<1x128xf32>
    %65 = vector.broadcast %63 : vector<4x1xf32> to vector<4x128xf32>
    %66 = vector.broadcast %64 : vector<1x128xf32> to vector<4x128xf32>
    %67 = arith.mulf %65, %66 : vector<4x128xf32>
    %68 = arith.addf %62, %67 : vector<4x128xf32>
    %69 = vector.extract_strided_slice %59 {offsets = [0, 1], sizes = [4, 1], strides = [1, 1]} : vector<4x6xf32> to vector<4x1xf32>
    %70 = vector.extract_strided_slice %58 {offsets = [1, 0], sizes = [1, 128], strides = [1, 1]} : vector<6x128xf32> to vector<1x128xf32>
    %71 = vector.broadcast %69 : vector<4x1xf32> to vector<4x128xf32>
    %72 = vector.broadcast %70 : vector<1x128xf32> to vector<4x128xf32>
    %73 = arith.mulf %71, %72 : vector<4x128xf32>
    %74 = arith.addf %68, %73 : vector<4x128xf32>
    %75 = vector.extract_strided_slice %59 {offsets = [0, 2], sizes = [4, 1], strides = [1, 1]} : vector<4x6xf32> to vector<4x1xf32>
    %76 = vector.extract_strided_slice %58 {offsets = [2, 0], sizes = [1, 128], strides = [1, 1]} : vector<6x128xf32> to vector<1x128xf32>
    %77 = vector.broadcast %75 : vector<4x1xf32> to vector<4x128xf32>
    %78 = vector.broadcast %76 : vector<1x128xf32> to vector<4x128xf32>
    %79 = arith.mulf %77, %78 : vector<4x128xf32>
    %80 = arith.addf %74, %79 : vector<4x128xf32>
    %81 = vector.extract_strided_slice %59 {offsets = [0, 3], sizes = [4, 1], strides = [1, 1]} : vector<4x6xf32> to vector<4x1xf32>
    %82 = vector.extract_strided_slice %58 {offsets = [3, 0], sizes = [1, 128], strides = [1, 1]} : vector<6x128xf32> to vector<1x128xf32>
    %83 = vector.broadcast %81 : vector<4x1xf32> to vector<4x128xf32>
    %84 = vector.broadcast %82 : vector<1x128xf32> to vector<4x128xf32>
    %85 = arith.mulf %83, %84 : vector<4x128xf32>
    %86 = arith.addf %80, %85 : vector<4x128xf32>
    %87 = vector.extract_strided_slice %59 {offsets = [0, 4], sizes = [4, 1], strides = [1, 1]} : vector<4x6xf32> to vector<4x1xf32>
    %88 = vector.extract_strided_slice %58 {offsets = [4, 0], sizes = [1, 128], strides = [1, 1]} : vector<6x128xf32> to vector<1x128xf32>
    %89 = vector.broadcast %87 : vector<4x1xf32> to vector<4x128xf32>
    %90 = vector.broadcast %88 : vector<1x128xf32> to vector<4x128xf32>
    %91 = arith.mulf %89, %90 : vector<4x128xf32>
    %92 = arith.addf %86, %91 : vector<4x128xf32>
    %93 = vector.extract_strided_slice %59 {offsets = [0, 5], sizes = [4, 1], strides = [1, 1]} : vector<4x6xf32> to vector<4x1xf32>
    %94 = vector.extract_strided_slice %58 {offsets = [5, 0], sizes = [1, 128], strides = [1, 1]} : vector<6x128xf32> to vector<1x128xf32>
    %95 = vector.broadcast %93 : vector<4x1xf32> to vector<4x128xf32>
    %96 = vector.broadcast %94 : vector<1x128xf32> to vector<4x128xf32>
    %97 = arith.mulf %95, %96 : vector<4x128xf32>
    %98 = arith.addf %92, %97 : vector<4x128xf32>
    %cst_10 = arith.constant 0.000000e+00 : f32
    %99 = vector.broadcast %cst_10 : f32 to vector<4x128xf32>
    %100 = arith.subf %99, %98 : vector<4x128xf32>
    %101 = math.exp %100 : vector<4x128xf32>
    %cst_11 = arith.constant 1.000000e+00 : f32
    %102 = vector.broadcast %cst_11 : f32 to vector<4x128xf32>
    %103 = arith.addf %102, %101 : vector<4x128xf32>
    %104 = tpu.reciprocal %103 : vector<4x128xf32> -> vector<4x128xf32>
    %c0_12 = arith.constant 0 : index
    %c0_13 = arith.constant 0 : index
    %105 = vector.load %arg6[%c0_12, %c0_13] : memref<1x4xf32, #tpu.memory_space<vmem>>, vector<1x4xf32>
    %c0_14 = arith.constant 0 : index
    %c0_15 = arith.constant 0 : index
    %106 = vector.load %arg7[%c0_14, %c0_15] : memref<1x1xf32, #tpu.memory_space<vmem>>, vector<1x1xf32>
    %107 = vector.shape_cast %106 : vector<1x1xf32> to vector<1x1xf32>
    %108 = vector.broadcast %107 : vector<1x1xf32> to vector<1x128xf32>
    %109 = vector.extract_strided_slice %105 {offsets = [0, 0], sizes = [1, 1], strides = [1, 1]} : vector<1x4xf32> to vector<1x1xf32>
    %110 = vector.extract_strided_slice %104 {offsets = [0, 0], sizes = [1, 128], strides = [1, 1]} : vector<4x128xf32> to vector<1x128xf32>
    %111 = vector.broadcast %109 : vector<1x1xf32> to vector<1x128xf32>
    %112 = arith.mulf %111, %110 : vector<1x128xf32>
    %113 = arith.addf %108, %112 : vector<1x128xf32>
    %114 = vector.extract_strided_slice %105 {offsets = [0, 1], sizes = [1, 1], strides = [1, 1]} : vector<1x4xf32> to vector<1x1xf32>
    %115 = vector.extract_strided_slice %104 {offsets = [1, 0], sizes = [1, 128], strides = [1, 1]} : vector<4x128xf32> to vector<1x128xf32>
    %116 = vector.broadcast %114 : vector<1x1xf32> to vector<1x128xf32>
    %117 = arith.mulf %116, %115 : vector<1x128xf32>
    %118 = arith.addf %113, %117 : vector<1x128xf32>
    %119 = vector.extract_strided_slice %105 {offsets = [0, 2], sizes = [1, 1], strides = [1, 1]} : vector<1x4xf32> to vector<1x1xf32>
    %120 = vector.extract_strided_slice %104 {offsets = [2, 0], sizes = [1, 128], strides = [1, 1]} : vector<4x128xf32> to vector<1x128xf32>
    %121 = vector.broadcast %119 : vector<1x1xf32> to vector<1x128xf32>
    %122 = arith.mulf %121, %120 : vector<1x128xf32>
    %123 = arith.addf %118, %122 : vector<1x128xf32>
    %124 = vector.extract_strided_slice %105 {offsets = [0, 3], sizes = [1, 1], strides = [1, 1]} : vector<1x4xf32> to vector<1x1xf32>
    %125 = vector.extract_strided_slice %104 {offsets = [3, 0], sizes = [1, 128], strides = [1, 1]} : vector<4x128xf32> to vector<1x128xf32>
    %126 = vector.broadcast %124 : vector<1x1xf32> to vector<1x128xf32>
    %127 = arith.mulf %126, %125 : vector<1x128xf32>
    %128 = arith.addf %123, %127 : vector<1x128xf32>
    %cst_16 = arith.constant 0.000000e+00 : f32
    %129 = vector.broadcast %cst_16 : f32 to vector<1x128xf32>
    %130 = arith.subf %129, %128 : vector<1x128xf32>
    %131 = math.exp %130 : vector<1x128xf32>
    %cst_17 = arith.constant 1.000000e+00 : f32
    %132 = vector.broadcast %cst_17 : f32 to vector<1x128xf32>
    %133 = arith.addf %132, %131 : vector<1x128xf32>
    %134 = tpu.reciprocal %133 : vector<1x128xf32> -> vector<1x128xf32>
    %c0_18 = arith.constant 0 : index
    %c0_19 = arith.constant 0 : index
    %135 = vector.load %arg8[%c0_18, %c0_19] : memref<1x128xf32, #tpu.memory_space<vmem>>, vector<1x128xf32>
    tpu.vector_store %arg8[%c0_18, %c0_19], %134 {strides = array<i32>} : memref<1x128xf32, #tpu.memory_space<vmem>>, vector<1x128xf32>,
    return
  }
  func.func @transform_0(%arg0: i32) -> (i32, i32) {
    %c0_i32 = arith.constant 0 : i32
    %c0_i32_0 = arith.constant 0 : i32
    return %c0_i32, %arg0 : i32, i32
  }
  func.func @transform_1(%arg0: i32) -> (i32, i32) {
    %c0_i32 = arith.constant 0 : i32
    %c0_i32_0 = arith.constant 0 : i32
    %c0_i32_1 = arith.constant 0 : i32
    return %c0_i32, %c0_i32_0 : i32, i32
  }
  func.func @transform_2(%arg0: i32) -> (i32, i32) {
    %c0_i32 = arith.constant 0 : i32
    %c0_i32_0 = arith.constant 0 : i32
    %c0_i32_1 = arith.constant 0 : i32
    return %c0_i32, %c0_i32_0 : i32, i32
  }
  func.func @transform_3(%arg0: i32) -> (i32, i32) {
    %c0_i32 = arith.constant 0 : i32
    %c0_i32_0 = arith.constant 0 : i32
    %c0_i32_1 = arith.constant 0 : i32
    return %c0_i32, %c0_i32_0 : i32, i32
  }
  func.func @transform_4(%arg0: i32) -> (i32, i32) {
    %c0_i32 = arith.constant 0 : i32
    %c0_i32_0 = arith.constant 0 : i32
    %c0_i32_1 = arith.constant 0 : i32
    return %c0_i32, %c0_i32_0 : i32, i32
  }
  func.func @transform_5(%arg0: i32) -> (i32, i32) {
    %c0_i32 = arith.constant 0 : i32
    %c0_i32_0 = arith.constant 0 : i32
    %c0_i32_1 = arith.constant 0 : i32
    return %c0_i32, %c0_i32_0 : i32, i32
  }
  func.func @transform_6(%arg0: i32) -> (i32, i32) {
    %c0_i32 = arith.constant 0 : i32
    %c0_i32_0 = arith.constant 0 : i32
    %c0_i32_1 = arith.constant 0 : i32
    return %c0_i32, %c0_i32_0 : i32, i32
  }
  func.func @transform_7(%arg0: i32) -> (i32, i32) {
    %c0_i32 = arith.constant 0 : i32
    %c0_i32_0 = arith.constant 0 : i32
    return %c0_i32, %arg0 : i32, i32
  }
}

</mosaic_0001>

<bundles_post_ra>
// kernel: tpu_custom_call.1
= control target key start
LH: loop header
LB: loop body
LE: loop exit
PB: predicated region body
PF: predicated region fallthrough
CT: control target
= control target key end

     0   :  { %s445_s0 = inlined_call_operand.vmem [shape: f32[8,128], index: 0, kind: input, shape index: {}]   ;;  %s446_s1 = inlined_call_operand.vmem [shape: f32[6,8], index: 1, kind: input, shape index: {}]   ;;  %s447_s2 = inlined_call_operand.vmem [shape: f32[6,1], index: 2, kind: input, shape index: {}]   ;;  %s448_s3 = inlined_call_operand.hbm [shape: f32[4,6], index: 3, kind: input, shape index: {}]   ;;  %s449_s4 = inlined_call_operand.vmem [shape: f32[4,1], index: 4, kind: input, shape index: {}]   ;;  %s450_s5 = inlined_call_operand.vmem [shape: f32[1,4], index: 5, kind: input, shape index: {}]   ;;  %s451_s6 = inlined_call_operand.<no memory space> [shape: f32[1,1], index: 6, kind: input, shape index: {}]   ;;  %s452_s7 = inlined_call_operand.hbm [shape: f32[1,128], index: 7, kind: output, shape index: {}]  }
   0x1   :  { %v12_v0 = vstv %s451_s6 }
   0x2   :  { %13 = vst [vmem:[#allocation2] sm:$0x1] %v12_v0 }
   0x3   :  { %14 = vsyncpa [#allocation4], 0 }
   0x4   :  { %15 = vsyncpa [#allocation5], 0  ;;  %s27_s28 = sshll.u32 %s448_s3, 4  ;;  %s371_s29 = smov [#allocation3]   ;;  %s28_s28 = int_to_ptr.hbm [resolvable:$true] %s27_s28 }
   0x5   :  { %s29_s30 = sshll.u32 %s371_s29, 4  ;;  %s30_s30 = int_to_ptr.vmem [resolvable:$true] %s29_s30 }
   0x6   :  { %32 = dma.hbm_to_vmem [thread:$0]  %s28_s28, 64, %s30_s30, [#allocation4]  }
   0x7   :  { %367 = dma.done.wait [#allocation4], 64  }
   0x8   :  { %368 = vsyncadd [#allocation4], 4294967232  ;;  %v372_v1 = vmov 0   ;;  %v373_v2 = vmov 1   ;;  %v374_v3 = vmov 3   ;;  %v375_v6 = vmov 2  }
   0x9   :  { %286 = vset.pattern.permute.xlu0 %v372_v1  ;;  %287 = vset.pattern.permute.xlu1 %v373_v2  ;;  %v44_v4 = vld [vmem:[%s446_s1] sm:$0x3f]  ;;  %v376_v7 = vmov 4   ;;  %v377_v8 = vmov 5   ;;  %v378_v9 = vmov 6   ;;  %v379_v10 = vmov 7  }
   0xa   :  { %289 = vset.pattern.permute.xlu2 %v374_v3  ;;  %53 = vperm.xlu0 %286, %v44_v4   ;;  %v45_v5 = vld [vmem:[%s447_s2] sm:$0x3f]  ;;  %s266_s15 = sshll.u32 %s452_s7, 4  ;;  %s267_s15 = int_to_ptr.hbm [resolvable:$true] %s266_s15 }
   0xb   :  { %60 = vperm.xlu1 %287, %v44_v4   ;;  %74 = vperm.xlu2 %289, %v44_v4   ;;  %v126_v11 = vld [vmem:[#allocation3] sm:$0xf]  ;;  %v194_v13 = vld [vmem:[%s450_s5] sm:$0x1] }
   0xc   :  { %v127_v12 = vld [vmem:[%s449_s4] sm:$0xf] }
   0xd   :  { %v195_v14 = vld [vmem:[#allocation2] sm:$0x1] }
   0xe   :  { %v43_v17 = vld [vmem:[%s445_s0] sm:$0xff]  ;;  %s380_s0 = smov [#allocation6]  }
   0xf   :  { %v56_v19 = vperm.slane %v43_v17, 0  ;;  %v63_v20 = vperm.slane %v43_v17, 1  ;;  %v70_v21 = vperm.slane %v43_v17, 2  ;;  %v77_v26 = vperm.slane %v43_v17, 3  ;;  %s264_s12 = sshll.u32 %s380_s0, 4  ;;  %s265_s12 = int_to_ptr.vmem [resolvable:$true] %s264_s12 }
  0x10   :  { %v84_v31 = vperm.slane %v43_v17, 4  ;;  %v91_v34 = vperm.slane %v43_v17, 5  ;;  %v98_v37 = vperm.slane %v43_v17, 6  ;;  %v105_v38 = vperm.slane %v43_v17, 7 }
  0x12   :  { %48 = vperm.xlu0 %286, %v45_v5  }
  0x13   :  { %288 = vset.pattern.permute.xlu1 %v375_v6  ;;  %290 = vset.pattern.permute.xlu2 %v376_v7 }
  0x14   :  { %67 = vperm.xlu1 %288, %v44_v4   ;;  %81 = vperm.xlu2 %290, %v44_v4  }
  0x1a   :  { %291 = vset.pattern.permute.xlu0 %v377_v8 }
  0x1b   :  { %88 = vperm.xlu0 %291, %v44_v4  }
  0x1c   :  { %292 = vset.pattern.permute.xlu1 %v378_v9  ;;  %293 = vset.pattern.permute.xlu2 %v379_v10 }
  0x1d   :  { %95 = vperm.xlu1 %292, %v44_v4   ;;  %102 = vperm.xlu2 %293, %v44_v4  }
  0x23   :  { %296 = vset.pattern.permute.xlu0 %v373_v2 }
  0x24   :  { %142 = vperm.xlu0 %296, %v126_v11  }
  0x25   :  { %294 = vset.pattern.permute.xlu1 %v372_v1  ;;  %295 = vset.pattern.permute.xlu2 %v372_v1 }
  0x26   :  { %135 = vperm.xlu1 %294, %v126_v11   ;;  %130 = vperm.xlu2 %295, %v127_v12  }
  0x2c   :  { %301 = vset.pattern.permute.xlu0 %v372_v1 }
  0x2d   :  { %204 = vperm.xlu0 %301, %v194_v13  }
  0x2e   :  { %297 = vset.pattern.permute.xlu1 %v375_v6  ;;  %298 = vset.pattern.permute.xlu2 %v374_v3 }
  0x2f   :  { %149 = vperm.xlu1 %297, %v126_v11   ;;  %156 = vperm.xlu2 %298, %v126_v11  }
  0x35   :  { %306 = vset.pattern.permute.xlu0 %v374_v3 }
  0x37   :  { %299 = vset.pattern.permute.xlu1 %v376_v7  ;;  %300 = vset.pattern.permute.xlu2 %v377_v8 }
  0x38   :  { %163 = vperm.xlu1 %299, %v126_v11   ;;  %170 = vperm.xlu2 %300, %v126_v11  }
  0x40   :  { %302 = vset.pattern.permute.xlu1 %v373_v2  ;;  %303 = vset.pattern.permute.xlu2 %v372_v1 }
  0x41   :  { %211 = vperm.xlu1 %302, %v194_v13   ;;  %198 = vperm.xlu2 %303, %v195_v14  }
  0x49   :  { %304 = vset.pattern.permute.xlu1 %v375_v6  ;;  %305 = vset.pattern.permute.xlu2 %v374_v3 }
  0x4a   :  { %221 = vperm.xlu1 %304, %v194_v13   ;;  %231 = vperm.xlu2 %305, %v194_v13  }
  0x65   :  { %v75_v15 = vpop.permute.xlu2 %74 }
  0x66   :  { %v78_v32 = vmul.f32 %v77_v26, %v75_v15 }
  0x6e   :  { %v82_v23 = vpop.permute.xlu2 %81 }
  0x6f   :  { %v85_v36 = vmul.f32 %v84_v31, %v82_v23 }
  0x77   :  { %v103_v41 = vpop.permute.xlu2 %102 }
  0x78   :  { %v106_v46 = vmul.f32 %v105_v38, %v103_v41 }
  0x7c   :  { %v54_v16 = vpop.permute.xlu0 %53 }
  0x7d   :  { %v61_v18 = vpop.permute.xlu1 %60  ;;  %v57_v22 = vmul.f32 %v56_v19, %v54_v16 }
  0x7e   :  { %v64_v25 = vmul.f32 %v63_v20, %v61_v18 }
  0x80   :  { %v131_v55 = vpop.permute.xlu2 %130 }
  0x84   :  { %v49_v24 = vpop.permute.xlu0 %48 }
  0x85   :  { %v58_v27 = vadd.f32 %v57_v22, %v49_v24 }
  0x86   :  { %v68_v28 = vpop.permute.xlu1 %67 }
  0x87   :  { %v71_v29 = vmul.f32 %v70_v21, %v68_v28  ;;  %v65_v30 = vadd.f32 %v64_v25, %v58_v27 }
  0x89   :  { %v72_v33 = vadd.f32 %v71_v29, %v65_v30  ;;  %v157_v2 = vpop.permute.xlu2 %156 }
  0x8b   :  { %v79_v35 = vadd.f32 %v78_v32, %v72_v33 }
  0x8d   :  { %v86_v39 = vadd.f32 %v85_v36, %v79_v35  ;;  %v89_v40 = vpop.permute.xlu0 %88 }
  0x8e   :  { %v92_v42 = vmul.f32 %v91_v34, %v89_v40 }
  0x8f   :  { %v96_v43 = vpop.permute.xlu1 %95 }
  0x90   :  { %v99_v44 = vmul.f32 %v98_v37, %v96_v43  ;;  %v93_v45 = vadd.f32 %v92_v42, %v86_v39 }
  0x92   :  { %v100_v47 = vadd.f32 %v99_v44, %v93_v45  ;;  %v171_v18 = vpop.permute.xlu2 %170 }
  0x94   :  { %v107_v48 = vadd.f32 %v106_v46, %v100_v47 }
  0x96   :  { %v108_v49 = vsub.f32 0.0, %v107_v48  ;;  %v143_v4 = vpop.permute.xlu0 %142 }
  0x98   :  { %v109_v50 = vmul.f32 1.442695, %v108_v49  ;;  %v136_v53 = vpop.permute.xlu1 %135 }
  0x9a   :  { %307 = vpow2.f32 %v109_v50 }
  0x9b   :  { %v199_v29 = vpop.permute.xlu2 %198 }
  0x9c   :  { %v201_v47 = vperm.slane %v199_v29, 0 }
  0x9f   :  { %v205_v35 = vpop.permute.xlu0 %204 }
  0xa0   :  { %v308_v51 = vpop.eup %307  ;;  %v207_v41 = vperm.slane %v205_v35, 0 }
  0xa1   :  { %v111_v52 = vadd.f32 1.0, %v308_v51  ;;  %v150_v63 = vpop.permute.xlu1 %149 }
  0xa3   :  { %309 = vrcp.f32 %v111_v52  ;;  %v123_v58 = vand.u32 2147483648, %v111_v52  ;;  %v121_v60 = vand.u32 2147483647, %v111_v52  ;;  %vm117_vm1 = vweird.f32 %v111_v52 }
  0xa4   :  { %v232_v38 = vpop.permute.xlu2 %231 }
  0xa5   :  { %v124_v62 = vor.u32 1.1754944e-38, %v123_v58  ;;  %vm122_vm3 = vcmp.eq.f32.partialorder %v121_v60, 8.507059e+37  ;;  %v234_v45 = vperm.slane %v232_v38, 0 }
  0xa9   :  { %v310_v54 = vpop.eup %309 }
  0xaa   :  { %v113_v56 = vmul.f32 %v310_v54, %v111_v52  ;;  %vm118_vm0 = vweird.f32 %v310_v54  ;;  %v164_v14 = vpop.permute.xlu1 %163 }
  0xab   :  { %vm119_vm2 = vmor %vm117_vm1, %vm118_vm0 }
  0xac   :  { %v114_v57 = vsub.f32 1.0, %v113_v56 }
  0xae   :  { %v115_v59 = vmul.f32 %v310_v54, %v114_v57 }
  0xb0   :  { %v116_v61 = vadd.f32 %v310_v54, %v115_v59 }
  0xb2   :  { %v120_v0 = vsel %vm119_vm2, %v310_v54, %v116_v61 }
  0xb3   :  { %v125_v1 = vsel %vm122_vm3, %v124_v62, %v120_v0  ;;  %v212_v28 = vpop.permute.xlu1 %211 }
  0xb4   :  { %v138_v3 = vperm.slane %v125_v1, 0  ;;  %v145_v5 = vperm.slane %v125_v1, 1  ;;  %v152_v7 = vperm.slane %v125_v1, 2  ;;  %v159_v9 = vperm.slane %v125_v1, 3 }
  0xb5   :  { %v166_v12 = vperm.slane %v125_v1, 4  ;;  %v173_v16 = vperm.slane %v125_v1, 5  ;;  %v214_v44 = vperm.slane %v212_v28, 0 }
  0xb6   :  { %v139_v6 = vmul.f32 %v138_v3, %v136_v53  ;;  %v146_v10 = vmul.f32 %v145_v5, %v143_v4  ;;  %v153_v11 = vmul.f32 %v152_v7, %v150_v63  ;;  %v160_v15 = vmul.f32 %v159_v9, %v157_v2 }
  0xb7   :  { %v167_v19 = vmul.f32 %v166_v12, %v164_v14  ;;  %v174_v21 = vmul.f32 %v173_v16, %v171_v18 }
  0xb8   :  { %v140_v8 = vadd.f32 %v139_v6, %v131_v55 }
  0xba   :  { %v147_v13 = vadd.f32 %v146_v10, %v140_v8 }
  0xbc   :  { %v154_v17 = vadd.f32 %v153_v11, %v147_v13  ;;  %v222_v34 = vpop.permute.xlu1 %221 }
  0xbd   :  { %v224_v40 = vperm.slane %v222_v34, 0 }
  0xbe   :  { %v161_v20 = vadd.f32 %v160_v15, %v154_v17 }
  0xc0   :  { %v168_v22 = vadd.f32 %v167_v19, %v161_v20 }
  0xc2   :  { %v175_v23 = vadd.f32 %v174_v21, %v168_v22 }
  0xc4   :  { %v176_v24 = vsub.f32 0.0, %v175_v23 }
  0xc6   :  { %v177_v25 = vmul.f32 1.442695, %v176_v24 }
  0xc8   :  { %311 = vpow2.f32 %v177_v25 }
  0xce   :  { %v312_v26 = vpop.eup %311 }
  0xcf   :  { %v179_v27 = vadd.f32 1.0, %v312_v26 }
  0xd1   :  { %313 = vrcp.f32 %v179_v27  ;;  %v191_v33 = vand.u32 2147483648, %v179_v27  ;;  %v189_v37 = vand.u32 2147483647, %v179_v27  ;;  %vm185_vm5 = vweird.f32 %v179_v27 }
  0xd3   :  { %v192_v42 = vor.u32 1.1754944e-38, %v191_v33  ;;  %vm190_vm7 = vcmp.eq.f32.partialorder %v189_v37, 8.507059e+37 }
  0xd7   :  { %v314_v30 = vpop.eup %313 }
  0xd8   :  { %v181_v31 = vmul.f32 %v314_v30, %v179_v27  ;;  %vm186_vm4 = vweird.f32 %v314_v30 }
  0xd9   :  { %vm187_vm6 = vmor %vm185_vm5, %vm186_vm4 }
  0xda   :  { %v182_v32 = vsub.f32 1.0, %v181_v31 }
  0xdc   :  { %v183_v36 = vmul.f32 %v314_v30, %v182_v32 }
  0xde   :  { %v184_v39 = vadd.f32 %v314_v30, %v183_v36 }
  0xe0   :  { %v188_v43 = vsel %vm187_vm6, %v314_v30, %v184_v39 }
  0xe1   :  { %v193_v46 = vsel %vm190_vm7, %v192_v42, %v188_v43 }
  0xe2   :  { %v215_v48 = vmul.f32 %v214_v44, %v193_v46  ;;  %v225_v49 = vmul.f32 %v224_v40, %v193_v46  ;;  %v208_v50 = vmul.f32 %v207_v41, %v193_v46  ;;  %v235_v52 = vmul.f32 %v234_v45, %v193_v46 }
  0xe4   :  { %v217_v51 = vrot.slane %v215_v48, 1  ;;  %v209_v53 = vadd.f32 %v208_v50, %v201_v47  ;;  %v227_v54 = vrot.slane %v225_v49, 2  ;;  %v237_v56 = vrot.slane %v235_v52, 3 }
  0xe6   :  { %v219_v55 = vadd.f32 %v217_v51, %v209_v53 }
  0xe8   :  { %v229_v57 = vadd.f32 %v227_v54, %v219_v55 }
  0xea   :  { %v239_v58 = vadd.f32 %v237_v56, %v229_v57 }
  0xec   :  { %v240_v59 = vsub.f32 0.0, %v239_v58 }
  0xee   :  { %v241_v60 = vmul.f32 1.442695, %v240_v59 }
  0xf0   :  { %315 = vpow2.f32 %v241_v60 }
  0xf6   :  { %v316_v61 = vpop.eup %315 }
  0xf7   :  { %v243_v62 = vadd.f32 1.0, %v316_v61 }
  0xf9   :  { %317 = vrcp.f32 %v243_v62  ;;  %v255_v2 = vand.u32 2147483648, %v243_v62  ;;  %v253_v4 = vand.u32 2147483647, %v243_v62  ;;  %vm249_vm9 = vweird.f32 %v243_v62 }
  0xfb   :  { %v256_v6 = vor.u32 1.1754944e-38, %v255_v2  ;;  %vm254_vm11 = vcmp.eq.f32.partialorder %v253_v4, 8.507059e+37 }
  0xff   :  { %v318_v63 = vpop.eup %317 }
 0x100   :  { %v245_v0 = vmul.f32 %v318_v63, %v243_v62  ;;  %vm250_vm8 = vweird.f32 %v318_v63 }
 0x101   :  { %vm251_vm10 = vmor %vm249_vm9, %vm250_vm8 }
 0x102   :  { %v246_v1 = vsub.f32 1.0, %v245_v0 }
 0x104   :  { %v247_v3 = vmul.f32 %v318_v63, %v246_v1 }
 0x106   :  { %v248_v5 = vadd.f32 %v318_v63, %v247_v3 }
 0x108   :  { %v252_v7 = vsel %vm251_vm10, %v318_v63, %v248_v5 }
 0x109   :  { %v257_v8 = vsel %vm254_vm11, %v256_v6, %v252_v7 }
 0x10a   :  { %258 = vst [vmem:[#allocation6] sm:$0x1] %v257_v8 }
 0x10b   :  { %269 = dma.vmem_to_hbm [thread:$0]  %s265_s12, 16, %s267_s15, [#allocation5]  }
 0x10c   :  { %369 = dma.done.wait [#allocation5], 16  }
 0x10d   :  { %370 = vsyncadd [#allocation5], 4294967280 }
 0x10e   :  { %274 = vsyncpa [#allocation4], 1 }
 0x10f   :  { %275 = vsyncpa [#allocation5], 1 }

</bundles_post_ra>
